<compile_context>
chip_gen: v5e
topology: v5e:2x2
jax: 0.10.0
libtpu: 0.0.40
codegen_flags: <defaults>
</compile_context>

<pallas_src>
import functools

import jax
import jax.numpy as jnp
from jax.experimental import pallas as pl
from jax.experimental.pallas import tpu as pltpu


def _bce_smooth_kernel(x_ref, t_ref, out_ref, acc_ref, *,
                       label_smoothing, block_rows, steps_per_part,
                       full_rows, rem, needs_mask):
    step = pl.program_id(1)

    @pl.when(step == 0)
    def _init():
        acc_ref[...] = jnp.zeros_like(acc_ref)

    x = x_ref[...].astype(jnp.float32)
    t = t_ref[...].astype(jnp.float32)
    t = t * (1.0 - label_smoothing) + 0.5 * label_smoothing
    # Stable BCE-with-logits.  log(1+u) matches log1p(u) to f32 precision here:
    # whenever u = exp(-|x|) is tiny the max(x,0) term dominates ce anyway.
    ce = jnp.maximum(x, 0.0) - x * t + jnp.log(1.0 + jnp.exp(-jnp.abs(x)))

    acc_rows = acc_ref.shape[0]
    if block_rows == acc_rows:
        def _accumulate(v):
            acc_ref[...] += v
    else:  # tiny single-block case: accumulator is padded up to 8 rows
        def _accumulate(v):
            acc_ref[0:block_rows, :] += v

    if not needs_mask:
        # Exactly-tiled problem: pure VPU/EUP elementwise accumulate, no mask.
        _accumulate(ce)
    else:
        part = pl.program_id(0)
        row0 = (part * steps_per_part + step) * block_rows
        block_is_clean = (row0 + block_rows) <= full_rows

        @pl.when(block_is_clean)
        def _clean():
            _accumulate(ce)

        @pl.when(jnp.logical_not(block_is_clean))
        def _ragged():
            # Only the boundary block pays for the mask.  Row-level compare
            # (+ lane compare for the single ragged row): no int32 overflow.
            rid = jax.lax.broadcasted_iota(jnp.int32, ce.shape, 0) + row0
            if rem:
                lid = jax.lax.broadcasted_iota(jnp.int32, ce.shape, 1)
                valid = (rid < full_rows) | ((rid == full_rows) & (lid < rem))
            else:
                valid = rid < full_rows
            _accumulate(jnp.where(valid, ce, 0.0))

    @pl.when(step == pl.num_programs(1) - 1)
    def _finalize():
        # Fold the (acc_rows, lane) accumulator down to one (8, 128) block so
        # the HBM writeback (and the wrapper-side reduce) is tiny.
        rows_s, lane_s = acc_ref.shape
        folded = acc_ref[0:8, :]
        for r in range(8, rows_s, 8):
            folded = folded + acc_ref[r:r + 8, :]
        out = folded[:, 0:128]
        for c in range(128, lane_s, 128):
            out = out + folded[:, c:c + 128]
        out_ref[...] = out


def bce_with_logits_loss_smoothing(logit, target, *, label_smoothing=0.0,
                                   reduction="mean", _max_block_bytes=(2 << 20)):
    """Label-smoothed BCE-with-logits.  logit/target: same shape (NCHW ok)."""
    if logit.shape != target.shape:
        raise ValueError("logit and target must have the same shape")
    total = int(logit.size)
    if total == 0:
        raise ValueError("empty input not supported")

    # Keep narrow float dtypes narrow (halves HBM traffic); widen only non-float.
    if not jnp.issubdtype(target.dtype, jnp.floating):
        target = target.astype(logit.dtype)

    # Lane-dense last dim: widest of 512/256/128 that divides total (zero-copy
    # reshape).  Otherwise pad the flat tail up to a multiple of 128.
    lane = None
    for cand in (512, 256, 128):
        if total % cand == 0:
            lane = cand
            break
    pad = 0
    if lane is None:
        lane = 128
        pad = (-total) % 128  # TODO(synk): only hit when total % 128 != 0 (copy).

    flat_x = logit.reshape(-1)
    flat_t = target.reshape(-1)
    if pad:
        flat_x = jnp.pad(flat_x, (0, pad))
        flat_t = jnp.pad(flat_t, (0, pad))

    rows = (total + pad) // lane          # rows present in the 2-D view
    full_rows = total // lane             # rows where every lane is valid
    rem = total % lane                    # valid lanes in the single ragged row

    # ~2 MiB f32 input blocks; full-array block (single step) if it all fits.
    max_block_rows = max(8, _max_block_bytes // (4 * lane))
    block_rows = rows if rows <= max_block_rows else max_block_rows
    steps_total = -(-rows // block_rows)

    # 2-way "parallel" part axis (megacore / 2-TC v7x) only when it divides the
    # block count exactly, so no block is ever fully out of range.  With the
    # tiny per-part output this is harmless on single-core chips.
    num_parts = 2 if (steps_total >= 2 and steps_total % 2 == 0) else 1
    steps_per_part = steps_total // num_parts

    acc_rows = -(-block_rows // 8) * 8
    needs_mask = (rem != 0) or (rows % block_rows != 0)

    x2d = flat_x.reshape(rows, lane)
    t2d = flat_t.reshape(rows, lane)

    kernel = functools.partial(
        _bce_smooth_kernel,
        label_smoothing=float(label_smoothing),
        block_rows=block_rows,
        steps_per_part=steps_per_part,
        full_rows=full_rows,
        rem=rem,
        needs_mask=needs_mask,
    )

    in_map = lambda p, i: (p * steps_per_part + i, 0)
    out_map = lambda p, i: (p, 0)   # output block resident across reduction axis

    partials = pl.pallas_call(
        kernel,
        out_shape=jax.ShapeDtypeStruct((num_parts * 8, 128), jnp.float32),
        grid_spec=pltpu.PrefetchScalarGridSpec(
            num_scalar_prefetch=0,
            grid=(num_parts, steps_per_part),
            in_specs=[
                pl.BlockSpec((block_rows, lane), in_map),
                pl.BlockSpec((block_rows, lane), in_map),
            ],
            out_specs=pl.BlockSpec((8, 128), out_map),
            scratch_shapes=[pltpu.VMEM((acc_rows, lane), jnp.float32)],
        ),
        compiler_params=pltpu.CompilerParams(
            dimension_semantics=("parallel", "arbitrary"),
        ),
    )(x2d, t2d)

    total_sum = jnp.sum(partials)       # <= (16, 128) f32: negligible
    if reduction == "mean":
        return total_sum / jnp.float32(total)
    if reduction == "sum":
        return total_sum
    raise NotImplementedError(f"reduction={reduction!r} not supported")


def _bce_ref(logit, target, *, label_smoothing=0.0, reduction="mean"):
    x = logit.astype(jnp.float32)
    t = target.astype(jnp.float32)
    t = t * (1.0 - label_smoothing) + 0.5 * label_smoothing
    ce = jnp.maximum(x, 0.0) - x * t + jnp.log1p(jnp.exp(-jnp.abs(x)))
    return jnp.mean(ce) if reduction == "mean" else jnp.sum(ce)


if __name__ == "__main__":
    key = jax.random.PRNGKey(0)

    # (shape, label_smoothing, reduction, extra kwargs)
    checks = [
        ((2, 4, 16, 16), 0.1, "mean", {}),     # primary: lane-aligned, 1 block
        ((2, 4, 16, 16), 0.1, "sum", {}),      # sum reduction
        ((3, 5, 7, 11), 0.05, "mean", {}),     # ragged: not a multiple of 128
        ((2, 4, 32, 32), 0.1, "mean", {"_max_block_bytes": 16384}),  # 2 parallel parts
        ((2, 4, 40, 32), 0.2, "mean", {"_max_block_bytes": 16384}),  # partial boundary block
    ]

    for idx, (shape, ls, red, kw) in enumerate(checks):
        k1, k2 = jax.random.split(jax.random.fold_in(key, idx))
        logit = jax.random.normal(k1, shape, dtype=jnp.float32) * 2.0
        target = jax.random.bernoulli(k2, 0.3, shape).astype(jnp.float32)

        out = jax.block_until_ready(
            bce_with_logits_loss_smoothing(logit, target, label_smoothing=ls,
                                           reduction=red, **kw))
        ref = jax.block_until_ready(
            _bce_ref(logit, target, label_smoothing=ls, reduction=red))
        assert jnp.allclose(out, ref, rtol=1e-5, atol=1e-6), (shape, red, out, ref)

    print("KERNEL_OK")
</pallas_src>

<mosaic_0001>
module attributes {stable_mosaic.version = 11 : i64} {
  func.func @_bce_smooth_kernel(%arg0: i32, %arg1: i32, %arg2: memref<4x512xf32, #tpu.memory_space<vmem>>, %arg3: memref<4x512xf32, #tpu.memory_space<vmem>>, %arg4: memref<8x128xf32, #tpu.memory_space<vmem>>, %arg5: memref<8x512xf32, #tpu.memory_space<vmem>>) attributes {dimension_semantics = [#tpu.dimension_semantics<parallel>, #tpu.dimension_semantics<arbitrary>], iteration_bounds = array<i64: 1, 1>, scalar_prefetch = 0 : i64, scratch_operands = 1 : i64, tpu.core_type = #tpu.core_type<tc>, window_params = [{transform_indices = @transform_0, window_bounds = array<i64: 4, 512>}, {transform_indices = @transform_1, window_bounds = array<i64: 4, 512>}, {transform_indices = @transform_2, window_bounds = array<i64: 8, 128>}]} {
    %c0_i32 = arith.constant 0 : i32
    %0 = arith.cmpi eq, %arg1, %c0_i32 : i32
    %1 = arith.extui %0 : i1 to i32
    %c0_i32_0 = arith.constant 0 : i32
    %2 = arith.cmpi ne, %1, %c0_i32_0 : i32
    scf.if %2 {
      %cst_14 = arith.constant 0.000000e+00 : f32
      %27 = vector.broadcast %cst_14 : f32 to vector<8x512xf32>
      %c0_15 = arith.constant 0 : index
      %c0_16 = arith.constant 0 : index
      %28 = vector.load %arg5[%c0_15, %c0_16] : memref<8x512xf32, #tpu.memory_space<vmem>>, vector<8x512xf32>
      tpu.vector_store %arg5[%c0_15, %c0_16], %27 {strides = array<i32>} : memref<8x512xf32, #tpu.memory_space<vmem>>, vector<8x512xf32>,
    } else {
    }
    %c0 = arith.constant 0 : index
    %c0_1 = arith.constant 0 : index
    %3 = vector.load %arg2[%c0, %c0_1] : memref<4x512xf32, #tpu.memory_space<vmem>>, vector<4x512xf32>
    %c0_2 = arith.constant 0 : index
    %c0_3 = arith.constant 0 : index
    %4 = vector.load %arg3[%c0_2, %c0_3] : memref<4x512xf32, #tpu.memory_space<vmem>>, vector<4x512xf32>
    %cst = arith.constant 0.899999976 : f32
    %5 = vector.broadcast %cst : f32 to vector<4x512xf32>
    %6 = arith.mulf %4, %5 : vector<4x512xf32>
    %cst_4 = arith.constant 5.000000e-02 : f32
    %7 = vector.broadcast %cst_4 : f32 to vector<4x512xf32>
    %8 = arith.addf %6, %7 : vector<4x512xf32>
    %cst_5 = arith.constant 0.000000e+00 : f32
    %9 = vector.broadcast %cst_5 : f32 to vector<4x512xf32>
    %10 = arith.maximumf %3, %9 : vector<4x512xf32>
    %11 = arith.mulf %3, %8 : vector<4x512xf32>
    %12 = arith.subf %10, %11 : vector<4x512xf32>
    %13 = math.absf %3 : vector<4x512xf32>
    %cst_6 = arith.constant 0.000000e+00 : f32
    %14 = vector.broadcast %cst_6 : f32 to vector<4x512xf32>
    %15 = arith.subf %14, %13 : vector<4x512xf32>
    %16 = math.exp %15 : vector<4x512xf32>
    %cst_7 = arith.constant 1.000000e+00 : f32
    %17 = vector.broadcast %cst_7 : f32 to vector<4x512xf32>
    %18 = arith.addf %17, %16 : vector<4x512xf32>
    %19 = math.log %18 : vector<4x512xf32>
    %20 = arith.addf %12, %19 : vector<4x512xf32>
    %c0_8 = arith.constant 0 : index
    %c0_9 = arith.constant 0 : index
    %21 = vector.load %arg5[%c0_8, %c0_9] : memref<8x512xf32, #tpu.memory_space<vmem>>, vector<4x512xf32>
    %22 = arith.addf %21, %20 : vector<4x512xf32>
    %c0_10 = arith.constant 0 : index
    %c0_11 = arith.constant 0 : index
    %23 = vector.load %arg5[%c0_10, %c0_11] : memref<8x512xf32, #tpu.memory_space<vmem>>, vector<4x512xf32>
    tpu.vector_store %arg5[%c0_10, %c0_11], %22 {strides = array<i32>} : memref<8x512xf32, #tpu.memory_space<vmem>>, vector<4x512xf32>,
    %c0_i32_12 = arith.constant 0 : i32
    %24 = arith.cmpi eq, %arg1, %c0_i32_12 : i32
    %25 = arith.extui %24 : i1 to i32
    %c0_i32_13 = arith.constant 0 : i32
    %26 = arith.cmpi ne, %25, %c0_i32_13 : i32
    scf.if %26 {
      %c0_14 = arith.constant 0 : index
      %c0_15 = arith.constant 0 : index
      %27 = vector.load %arg5[%c0_14, %c0_15] : memref<8x512xf32, #tpu.memory_space<vmem>>, vector<8x512xf32>
      %28 = vector.extract_strided_slice %27 {offsets = [0, 0], sizes = [8, 128], strides = [1, 1]} : vector<8x512xf32> to vector<8x128xf32>
      %29 = vector.extract_strided_slice %27 {offsets = [0, 128], sizes = [8, 128], strides = [1, 1]} : vector<8x512xf32> to vector<8x128xf32>
      %30 = arith.addf %28, %29 : vector<8x128xf32>
      %31 = vector.extract_strided_slice %27 {offsets = [0, 256], sizes = [8, 128], strides = [1, 1]} : vector<8x512xf32> to vector<8x128xf32>
      %32 = arith.addf %30, %31 : vector<8x128xf32>
      %33 = vector.extract_strided_slice %27 {offsets = [0, 384], sizes = [8, 128], strides = [1, 1]} : vector<8x512xf32> to vector<8x128xf32>
      %34 = arith.addf %32, %33 : vector<8x128xf32>
      %c0_16 = arith.constant 0 : index
      %c0_17 = arith.constant 0 : index
      %35 = vector.load %arg4[%c0_16, %c0_17] : memref<8x128xf32, #tpu.memory_space<vmem>>, vector<8x128xf32>
      tpu.vector_store %arg4[%c0_16, %c0_17], %34 {strides = array<i32>} : memref<8x128xf32, #tpu.memory_space<vmem>>, vector<8x128xf32>,
    } else {
    }
    return
  }
  func.func @transform_0(%arg0: i32, %arg1: i32) -> (i32, i32) {
    %c1_i32 = arith.constant 1 : i32
    %0 = arith.muli %arg0, %c1_i32 : i32
    %1 = arith.addi %0, %arg1 : i32
    %c0_i32 = arith.constant 0 : i32
    %c0_i32_0 = arith.constant 0 : i32
    return %1, %c0_i32 : i32, i32
  }
  func.func @transform_1(%arg0: i32, %arg1: i32) -> (i32, i32) {
    %c1_i32 = arith.constant 1 : i32
    %0 = arith.muli %arg0, %c1_i32 : i32
    %1 = arith.addi %0, %arg1 : i32
    %c0_i32 = arith.constant 0 : i32
    %c0_i32_0 = arith.constant 0 : i32
    return %1, %c0_i32 : i32, i32
  }
  func.func @transform_2(%arg0: i32, %arg1: i32) -> (i32, i32) {
    %c0_i32 = arith.constant 0 : i32
    %c0_i32_0 = arith.constant 0 : i32
    return %arg0, %c0_i32 : i32, i32
  }
}

</mosaic_0001>

<bundles_post_ra>
// kernel: tpu_custom_call.1
= control target key start
LH: loop header
LB: loop body
LE: loop exit
PB: predicated region body
PF: predicated region fallthrough
CT: control target
= control target key end

     0   :  { %7 = vsyncpa [#allocation4], 0  ;;  %s260_s0 = inlined_call_operand.hbm [shape: f32[4,512], index: 0, kind: input, shape index: {}]   ;;  %s261_s1 = inlined_call_operand.hbm [shape: f32[4,512], index: 1, kind: input, shape index: {}]   ;;  %s262_s2 = inlined_call_operand.hbm [shape: f32[8,128], index: 2, kind: output, shape index: {}]  }
   0x1   :  { %8 = vsyncpa [#allocation7], 0 }
   0x2   :  { %9 = vsyncpa [#allocation5], 0  ;;  %s19_s11 = sshll.u32 %s260_s0, 4  ;;  %s232_s12 = smov [#allocation3]   ;;  %s20_s11 = int_to_ptr.hbm [resolvable:$true] %s19_s11 }
   0x3   :  { %s21_s13 = sshll.u32 %s232_s12, 4  ;;  %s34_s16 = sshll.u32 %s261_s1, 4  ;;  %s22_s13 = int_to_ptr.vmem [resolvable:$true] %s21_s13  ;;  %s35_s16 = int_to_ptr.hbm [resolvable:$true] %s34_s16 }
   0x4   :  { %24 = dma.hbm_to_vmem [thread:$0]  %s20_s11, 256, %s22_s13, [#allocation4]  }
   0x5   :  { %s233_s17 = smov [#allocation6]  }
   0x6   :  { %s36_s18 = sshll.u32 %s233_s17, 4  ;;  %s37_s18 = int_to_ptr.vmem [resolvable:$true] %s36_s18 }
   0x7   :  { %39 = dma.hbm_to_vmem [thread:$0]  %s35_s16, 256, %s37_s18, [#allocation7]  }
   0x8   :  { %226 = dma.done.wait [#allocation4], 256  }
   0x9   :  { %227 = vsyncadd [#allocation4], 4294967040 }
   0xa   :  { %228 = dma.done.wait [#allocation7], 256  }
   0xb   :  { %229 = vsyncadd [#allocation7], 4294967040  ;;  %v234_v0 = vmov 0.0   ;;  %v58_v1 = vld [vmem:[#allocation3] sm:$0xff]  ;;  %v59_v2 = vld [vmem:[#allocation3 + $0x8] sm:$0xff]  ;;  %s235_s0 = smov [#allocation8]  }
   0xc   :  { %54 = vst [vmem:[#allocation2 + $0x10] sm:$0xff] %v234_v0  ;;  %v72_v3 = vand.u32 2147483647, %v58_v1  ;;  %v73_v4 = vand.u32 2147483647, %v59_v2  ;;  %v60_v8 = vld [vmem:[#allocation6] sm:$0xff] }
   0xd   :  { %55 = vst [vmem:[#allocation2] sm:$0xff] %v234_v0  ;;  %v61_v10 = vld [vmem:[#allocation6 + $0x8] sm:$0xff]  ;;  %v62_v11 = vmul.f32 0.9, %v60_v8  ;;  %v66_v19 = vmax.f32 %v58_v1, 0.0  ;;  %v67_v21 = vmax.f32 %v59_v2, 0.0 }
   0xe   :  { %56 = vst [vmem:[#allocation2 + $0x18] sm:$0xff] %v234_v0  ;;  %v74_v5 = vsub.f32 0.0, %v72_v3  ;;  %v75_v6 = vsub.f32 0.0, %v73_v4  ;;  %v63_v12 = vmul.f32 0.9, %v61_v10  ;;  %s129_s1 = sshll.u32 %s235_s0, 4  ;;  %s130_s1 = int_to_ptr.vmem [resolvable:$true] %s129_s1 }
   0xf   :  { %57 = vst [vmem:[#allocation2 + $0x8] sm:$0xff] %v234_v0  ;;  %v64_v14 = vadd.f32 0.05, %v62_v11  ;;  %s131_s21 = sshll.u32 %s262_s2, 4  ;;  %s132_s21 = int_to_ptr.hbm [resolvable:$true] %s131_s21 }
  0x10   :  { %v76_v7 = vmul.f32 1.442695, %v74_v5  ;;  %v78_v9 = vmul.f32 1.442695, %v75_v6  ;;  %v65_v17 = vadd.f32 0.05, %v63_v12 }
  0x11   :  { %v68_v20 = vmul.f32 %v64_v14, %v58_v1 }
  0x12   :  { %146 = vpow2.f32 %v76_v7  ;;  %v69_v22 = vmul.f32 %v65_v17, %v59_v2 }
  0x13   :  { %148 = vpow2.f32 %v78_v9  ;;  %v70_v23 = vsub.f32 %v66_v19, %v68_v20  ;;  %v88_v31 = vld [vmem:[#allocation2 + $0x10] sm:$0xf] }
  0x14   :  { %v71_v25 = vsub.f32 %v67_v21, %v69_v22  ;;  %v89_v32 = vld [vmem:[#allocation2] sm:$0xf] }
  0x15   :  { %v90_v33 = vld [vmem:[#allocation2 + $0x18] sm:$0xf] }
  0x16   :  { %v91_v34 = vld [vmem:[#allocation2 + $0x8] sm:$0xf] }
  0x18   :  { %v147_v13 = vpop.eup %146 }
  0x19   :  { %v149_v15 = vpop.eup %148  ;;  %v80_v16 = vadd.f32 1.0, %v147_v13 }
  0x1a   :  { %v81_v18 = vadd.f32 1.0, %v149_v15 }
  0x1b   :  { %150 = vlog2.f32 %v80_v16 }
  0x1c   :  { %152 = vlog2.f32 %v81_v18 }
  0x21   :  { %v151_v24 = vpop.eup %150 }
  0x22   :  { %v153_v26 = vpop.eup %152  ;;  %v83_v27 = vmul.f32 0.6931472, %v151_v24 }
  0x23   :  { %v85_v28 = vmul.f32 0.6931472, %v153_v26 }
  0x24   :  { %v86_v29 = vadd.f32 %v83_v27, %v70_v23 }
  0x25   :  { %v87_v30 = vadd.f32 %v85_v28, %v71_v25 }
  0x26   :  { %94 = vst [vmem:[#allocation1] ss:$2 sm:$0xff] %v86_v29 }
  0x27   :  { %96 = vst [vmem:[#allocation1 + $0x10] ss:$2 sm:$0xff] %v87_v30 }
  0x2d   :  { %v97_v35 = vld.sshfl [vmem:[#allocation1] sm:$0xff pattern:$0x75316420]  ;;  %v98_v36 = vld.sshfl [vmem:[#allocation1 + $0x8] sm:$0xff pattern:$0x75316420] }
  0x2e   :  { %v105_v37 = vadd.f32 %v97_v35, %v88_v31  ;;  %v106_v38 = vadd.f32 %v98_v36, %v89_v32  ;;  %v99_v39 = vld.sshfl [vmem:[#allocation1 + $0x10] sm:$0xff pattern:$0x75316420]  ;;  %v100_v40 = vld.sshfl [vmem:[#allocation1 + $0x18] sm:$0xff pattern:$0x75316420] }
  0x2f   :  { %v107_v41 = vadd.f32 %v99_v39, %v90_v33  ;;  %v108_v42 = vadd.f32 %v100_v40, %v91_v34 }
  0x30   :  { %109 = vst [vmem:[#allocation2 + $0x10] sm:$0xf] %v105_v37 }
  0x31   :  { %110 = vst [vmem:[#allocation2] sm:$0xf] %v106_v38 }
  0x32   :  { %111 = vst [vmem:[#allocation2 + $0x18] sm:$0xf] %v107_v41 }
  0x33   :  { %112 = vst [vmem:[#allocation2 + $0x8] sm:$0xf] %v108_v42 }
  0x37   :  { %v116_v43 = vld [vmem:[#allocation2 + $0x10] sm:$0xff] }
  0x38   :  { %v117_v44 = vld [vmem:[#allocation2] sm:$0xff] }
  0x39   :  { %v120_v45 = vadd.f32 %v117_v44, %v116_v43  ;;  %v118_v46 = vld [vmem:[#allocation2 + $0x18] sm:$0xff] }
  0x3a   :  { %v119_v48 = vld [vmem:[#allocation2 + $0x8] sm:$0xff] }
  0x3b   :  { %v121_v47 = vadd.f32 %v120_v45, %v118_v46 }
  0x3d   :  { %v122_v49 = vadd.f32 %v121_v47, %v119_v48 }
  0x3f   :  { %123 = vst [vmem:[#allocation8] sm:$0xff] %v122_v49 }
  0x40   :  { %134 = dma.vmem_to_hbm [thread:$0]  %s130_s1, 128, %s132_s21, [#allocation5]  }
  0x41   :  { %230 = dma.done.wait [#allocation5], 128  }
  0x42   :  { %231 = vsyncadd [#allocation5], 4294967168 }
  0x43   :  { %139 = vsyncpa [#allocation4], 1 }
  0x44   :  { %140 = vsyncpa [#allocation7], 1 }
  0x45   :  { %141 = vsyncpa [#allocation5], 1 }

</bundles_post_ra>
